<compile_context>
chip_gen: v6e
topology: v6e:2x2x1
jax: 0.10.0
libtpu: 0.0.40
codegen_flags: <defaults>
</compile_context>

<pallas_src>
import jax
import jax.numpy as jnp
from jax.experimental import pallas as pl
from jax.experimental.pallas import tpu as pltpu


def _round_up(x, m):
    return ((x + m - 1) // m) * m


def critic_kernel(s_ref, a_ref, w1_ref, w2_ref, b12_ref, w3_ref, b3_ref,
                  wo_ref, bo_ref, q_ref):
    # layer_1(s) + layer_2(a): two small-K MXU dots, pre-summed bias, relu.
    # f32 accumulation throughout (no bf16 quantization).
    h = (jnp.dot(s_ref[...], w1_ref[...], preferred_element_type=jnp.float32)
         + jnp.dot(a_ref[...], w2_ref[...], preferred_element_type=jnp.float32)
         + b12_ref[...])
    h = jnp.maximum(h, 0.0)

    # layer_3 + relu.
    h = jnp.dot(h, w3_ref[...], preferred_element_type=jnp.float32) + b3_ref[...]
    h = jnp.maximum(h, 0.0)

    # output Linear(64, 1): contract the hidden dim of (1, H) x (TB, H) on the
    # otherwise-idle MXU -> a lane-dense (1, TB) row (unmasked vector stores)
    # instead of a masked lane-sparse (TB, 1) column.
    q = jax.lax.dot_general(
        wo_ref[...], h,
        dimension_numbers=(((1,), (1,)), ((), ())),
        preferred_element_type=jnp.float32)
    q_ref[...] = (q + bo_ref[...]).reshape(q_ref.shape)


def critic_forward(s, a, params, *, tb_max=8192):
    """s: [B, state_dim], a: [B, action_dim] -> q: [B, 1] (float32)."""
    (w1, b1, w2, b2, w3, b3, wo, bo) = params
    B, state_dim = s.shape
    action_dim = a.shape[1]
    hidden = w3.shape[0]

    s = s.astype(jnp.float32)
    a = a.astype(jnp.float32)
    w1f = w1.astype(jnp.float32)
    w2f = w2.astype(jnp.float32)
    b12 = (b1 + b2).reshape(1, hidden).astype(jnp.float32)   # fused bias
    w3f = w3.astype(jnp.float32)
    b3f = b3.reshape(1, hidden).astype(jnp.float32)
    wo_row = wo.reshape(1, hidden).astype(jnp.float32)
    bof = bo.reshape(1, 1).astype(jnp.float32)

    # Batch tiling: big tiles amortize per-step overhead; TB is a multiple of
    # 128 so the (1, TB) output row is lane-dense; >=2 grid steps for large
    # batches so v7x can shard the "parallel" axis over both TensorCores.
    tb_max = _round_up(max(tb_max, 128), 128)
    min_steps = 2 if B >= 256 else 1
    steps = max(min_steps, pl.cdiv(B, tb_max))
    TB = min(tb_max, _round_up(pl.cdiv(B, steps), 128))
    grid_b = pl.cdiv(B, TB)
    Bp = grid_b * TB
    if Bp != B:
        # TODO(synk): for huge B pad only the tail slab (jnp.pad copies all of
        # s/a); with the adaptive TB above the padded region is < TB rows.
        s = jnp.pad(s, ((0, Bp - B), (0, 0)))
        a = jnp.pad(a, ((0, Bp - B), (0, 0)))

    resident = lambda r, c: pl.BlockSpec((r, c), lambda i: (0, 0))

    q_rows = pl.pallas_call(
        critic_kernel,
        out_shape=jax.ShapeDtypeStruct((grid_b, 1, TB), jnp.float32),
        grid=(grid_b,),
        in_specs=[
            pl.BlockSpec((TB, state_dim), lambda i: (i, 0)),   # s  (pipelined)
            pl.BlockSpec((TB, action_dim), lambda i: (i, 0)),  # a  (pipelined)
            resident(state_dim, hidden),     # w1   (VMEM-resident)
            resident(action_dim, hidden),    # w2
            resident(1, hidden),             # b1 + b2
            resident(hidden, hidden),        # w3
            resident(1, hidden),             # b3
            resident(1, hidden),             # wo (as a row)
            resident(1, 1),                  # bo
        ],
        out_specs=pl.BlockSpec((1, 1, TB), lambda i: (i, 0, 0)),
        compiler_params=pltpu.CompilerParams(
            dimension_semantics=("parallel",),
            vmem_limit_bytes=48 * 1024 * 1024,
        ),
    )(s, a, w1f, w2f, b12, w3f, b3f, wo_row, bof)

    # (grid_b, 1, TB) is contiguous in batch order -> free reshape.
    q = q_rows.reshape(Bp, 1)
    return q if Bp == B else q[:B]


def init_params(key, state_dim, action_dim, hidden=64, out_dim=1):
    """Mirrors the PyTorch module init. Weights stored transposed: [in, out].

    layer_1/2/3: weight ~ N(0, 0.1), bias = 0.1
    output:      nn.Linear-default-style uniform(+-1/sqrt(fan_in)).
    """
    k1, k2, k3, k4, k5 = jax.random.split(key, 5)
    w1 = 0.1 * jax.random.normal(k1, (state_dim, hidden), jnp.float32)
    b1 = jnp.full((1, hidden), 0.1, jnp.float32)
    w2 = 0.1 * jax.random.normal(k2, (action_dim, hidden), jnp.float32)
    b2 = jnp.full((1, hidden), 0.1, jnp.float32)
    w3 = 0.1 * jax.random.normal(k3, (hidden, hidden), jnp.float32)
    b3 = jnp.full((1, hidden), 0.1, jnp.float32)
    bound = 1.0 / float(hidden) ** 0.5
    wo = jax.random.uniform(k4, (hidden, out_dim), jnp.float32, -bound, bound)
    bo = jax.random.uniform(k5, (1, out_dim), jnp.float32, -bound, bound)
    return (w1, b1, w2, b2, w3, b3, wo, bo)


def critic_ref(s, a, params):
    """Pure-JAX f32 reference."""
    (w1, b1, w2, b2, w3, b3, wo, bo) = params
    h = jnp.maximum(s @ w1 + b1 + a @ w2 + b2, 0.0)
    h = jnp.maximum(h @ w3 + b3, 0.0)
    return h @ wo + bo


if __name__ == "__main__":
    key = jax.random.PRNGKey(0)
    state_dim, action_dim = 16, 4
    kp, ks, ka = jax.random.split(key, 3)
    params = init_params(kp, state_dim, action_dim)

    fwd = jax.jit(critic_forward)

    # batch=2 exercises a single small tile; batch=530 exercises a 2-step
    # "parallel" grid with a padded final tile.
    for batch in (2, 530):
        s = jax.random.normal(jax.random.fold_in(ks, batch),
                              (batch, state_dim), jnp.float32)
        a = jax.random.normal(jax.random.fold_in(ka, batch),
                              (batch, action_dim), jnp.float32)

        q = fwd(s, a, params)
        jax.block_until_ready(q)
        assert q.shape == (batch, 1), q.shape

        q_ref = critic_ref(s, a, params)
        assert jnp.allclose(q, q_ref, atol=2e-2, rtol=2e-2), (
            batch, float(jnp.max(jnp.abs(q - q_ref))))

    print("KERNEL_OK")
</pallas_src>

<mosaic_0001>
module attributes {stable_mosaic.version = 11 : i64} {
  func.func @critic_kernel(%arg0: i32, %arg1: memref<128x16xf32, #tpu.memory_space<vmem>>, %arg2: memref<128x4xf32, #tpu.memory_space<vmem>>, %arg3: memref<16x64xf32, #tpu.memory_space<vmem>>, %arg4: memref<4x64xf32, #tpu.memory_space<vmem>>, %arg5: memref<1x64xf32, #tpu.memory_space<vmem>>, %arg6: memref<64x64xf32, #tpu.memory_space<vmem>>, %arg7: memref<1x64xf32, #tpu.memory_space<vmem>>, %arg8: memref<1x64xf32, #tpu.memory_space<vmem>>, %arg9: memref<1x1xf32, #tpu.memory_space<vmem>>, %arg10: memref<1x1x128xf32, #tpu.memory_space<vmem>>) attributes {dimension_semantics = [#tpu.dimension_semantics<parallel>], iteration_bounds = array<i64: 1>, scalar_prefetch = 0 : i64, scratch_operands = 0 : i64, tpu.core_type = #tpu.core_type<tc>, window_params = [{transform_indices = @transform_0, window_bounds = array<i64: 128, 16>}, {transform_indices = @transform_1, window_bounds = array<i64: 128, 4>}, {pipeline_mode = #tpu.pipeline_mode<synchronous>, transform_indices = @transform_2, window_bounds = array<i64: 16, 64>}, {pipeline_mode = #tpu.pipeline_mode<synchronous>, transform_indices = @transform_3, window_bounds = array<i64: 4, 64>}, {pipeline_mode = #tpu.pipeline_mode<synchronous>, transform_indices = @transform_4, window_bounds = array<i64: 1, 64>}, {pipeline_mode = #tpu.pipeline_mode<synchronous>, transform_indices = @transform_5, window_bounds = array<i64: 64, 64>}, {pipeline_mode = #tpu.pipeline_mode<synchronous>, transform_indices = @transform_6, window_bounds = array<i64: 1, 64>}, {pipeline_mode = #tpu.pipeline_mode<synchronous>, transform_indices = @transform_7, window_bounds = array<i64: 1, 64>}, {pipeline_mode = #tpu.pipeline_mode<synchronous>, transform_indices = @transform_8, window_bounds = array<i64: 1, 1>}, {transform_indices = @transform_9, window_bounds = array<i64: 1, 1, 128>}]} {
    %c0 = arith.constant 0 : index
    %c0_0 = arith.constant 0 : index
    %0 = vector.load %arg1[%c0, %c0_0] : memref<128x16xf32, #tpu.memory_space<vmem>>, vector<128x16xf32>
    %c0_1 = arith.constant 0 : index
    %c0_2 = arith.constant 0 : index
    %1 = vector.load %arg3[%c0_1, %c0_2] : memref<16x64xf32, #tpu.memory_space<vmem>>, vector<16x64xf32>
    %cst = arith.constant dense<0.000000e+00> : vector<128x64xf32>
    %2 = tpu.matmul %0, %1, %cst {dimension_numbers = #tpu.dot_dimension_numbers<[1], [0], [0], [1], [0, 0, 1, 1], [], []>} : vector<128x16xf32>, vector<16x64xf32>, vector<128x64xf32> -> vector<128x64xf32>
    %c0_3 = arith.constant 0 : index
    %c0_4 = arith.constant 0 : index
    %3 = vector.load %arg2[%c0_3, %c0_4] : memref<128x4xf32, #tpu.memory_space<vmem>>, vector<128x4xf32>
    %c0_5 = arith.constant 0 : index
    %c0_6 = arith.constant 0 : index
    %4 = vector.load %arg4[%c0_5, %c0_6] : memref<4x64xf32, #tpu.memory_space<vmem>>, vector<4x64xf32>
    %cst_7 = arith.constant dense<0.000000e+00> : vector<128x64xf32>
    %5 = tpu.matmul %3, %4, %cst_7 {dimension_numbers = #tpu.dot_dimension_numbers<[1], [0], [0], [1], [0, 0, 1, 1], [], []>} : vector<128x4xf32>, vector<4x64xf32>, vector<128x64xf32> -> vector<128x64xf32>
    %6 = arith.addf %2, %5 : vector<128x64xf32>
    %c0_8 = arith.constant 0 : index
    %c0_9 = arith.constant 0 : index
    %7 = vector.load %arg5[%c0_8, %c0_9] : memref<1x64xf32, #tpu.memory_space<vmem>>, vector<1x64xf32>
    %8 = vector.broadcast %7 : vector<1x64xf32> to vector<128x64xf32>
    %9 = arith.addf %6, %8 : vector<128x64xf32>
    %cst_10 = arith.constant 0.000000e+00 : f32
    %10 = vector.broadcast %cst_10 : f32 to vector<128x64xf32>
    %11 = arith.maximumf %9, %10 : vector<128x64xf32>
    %c0_11 = arith.constant 0 : index
    %c0_12 = arith.constant 0 : index
    %12 = vector.load %arg6[%c0_11, %c0_12] : memref<64x64xf32, #tpu.memory_space<vmem>>, vector<64x64xf32>
    %cst_13 = arith.constant dense<0.000000e+00> : vector<128x64xf32>
    %13 = tpu.matmul %11, %12, %cst_13 {dimension_numbers = #tpu.dot_dimension_numbers<[1], [0], [0], [1], [0, 0, 1, 1], [], []>} : vector<128x64xf32>, vector<64x64xf32>, vector<128x64xf32> -> vector<128x64xf32>
    %c0_14 = arith.constant 0 : index
    %c0_15 = arith.constant 0 : index
    %14 = vector.load %arg7[%c0_14, %c0_15] : memref<1x64xf32, #tpu.memory_space<vmem>>, vector<1x64xf32>
    %15 = vector.broadcast %14 : vector<1x64xf32> to vector<128x64xf32>
    %16 = arith.addf %13, %15 : vector<128x64xf32>
    %cst_16 = arith.constant 0.000000e+00 : f32
    %17 = vector.broadcast %cst_16 : f32 to vector<128x64xf32>
    %18 = arith.maximumf %16, %17 : vector<128x64xf32>
    %c0_17 = arith.constant 0 : index
    %c0_18 = arith.constant 0 : index
    %19 = vector.load %arg8[%c0_17, %c0_18] : memref<1x64xf32, #tpu.memory_space<vmem>>, vector<1x64xf32>
    %cst_19 = arith.constant dense<0.000000e+00> : vector<1x128xf32>
    %20 = tpu.matmul %19, %18, %cst_19 {dimension_numbers = #tpu.dot_dimension_numbers<[1], [1], [0], [0], [0, 0, 1, 0], [], []>} : vector<1x64xf32>, vector<128x64xf32>, vector<1x128xf32> -> vector<1x128xf32>
    %c0_20 = arith.constant 0 : index
    %c0_21 = arith.constant 0 : index
    %21 = vector.load %arg9[%c0_20, %c0_21] : memref<1x1xf32, #tpu.memory_space<vmem>>, vector<1x1xf32>
    %22 = vector.broadcast %21 : vector<1x1xf32> to vector<1x128xf32>
    %23 = arith.addf %20, %22 : vector<1x128xf32>
    %24 = vector.shape_cast %23 : vector<1x128xf32> to vector<1x1x128xf32>
    %c0_22 = arith.constant 0 : index
    %c0_23 = arith.constant 0 : index
    %c0_24 = arith.constant 0 : index
    %25 = vector.load %arg10[%c0_22, %c0_23, %c0_24] : memref<1x1x128xf32, #tpu.memory_space<vmem>>, vector<1x1x128xf32>
    tpu.vector_store %arg10[%c0_22, %c0_23, %c0_24], %24 {strides = array<i32>} : memref<1x1x128xf32, #tpu.memory_space<vmem>>, vector<1x1x128xf32>,
    return
  }
  func.func @transform_0(%arg0: i32) -> (i32, i32) {
    %c0_i32 = arith.constant 0 : i32
    %c0_i32_0 = arith.constant 0 : i32
    return %arg0, %c0_i32 : i32, i32
  }
  func.func @transform_1(%arg0: i32) -> (i32, i32) {
    %c0_i32 = arith.constant 0 : i32
    %c0_i32_0 = arith.constant 0 : i32
    return %arg0, %c0_i32 : i32, i32
  }
  func.func @transform_2(%arg0: i32) -> (i32, i32) {
    %c0_i32 = arith.constant 0 : i32
    %c0_i32_0 = arith.constant 0 : i32
    %c0_i32_1 = arith.constant 0 : i32
    return %c0_i32, %c0_i32_0 : i32, i32
  }
  func.func @transform_3(%arg0: i32) -> (i32, i32) {
    %c0_i32 = arith.constant 0 : i32
    %c0_i32_0 = arith.constant 0 : i32
    %c0_i32_1 = arith.constant 0 : i32
    return %c0_i32, %c0_i32_0 : i32, i32
  }
  func.func @transform_4(%arg0: i32) -> (i32, i32) {
    %c0_i32 = arith.constant 0 : i32
    %c0_i32_0 = arith.constant 0 : i32
    %c0_i32_1 = arith.constant 0 : i32
    return %c0_i32, %c0_i32_0 : i32, i32
  }
  func.func @transform_5(%arg0: i32) -> (i32, i32) {
    %c0_i32 = arith.constant 0 : i32
    %c0_i32_0 = arith.constant 0 : i32
    %c0_i32_1 = arith.constant 0 : i32
    return %c0_i32, %c0_i32_0 : i32, i32
  }
  func.func @transform_6(%arg0: i32) -> (i32, i32) {
    %c0_i32 = arith.constant 0 : i32
    %c0_i32_0 = arith.constant 0 : i32
    %c0_i32_1 = arith.constant 0 : i32
    return %c0_i32, %c0_i32_0 : i32, i32
  }
  func.func @transform_7(%arg0: i32) -> (i32, i32) {
    %c0_i32 = arith.constant 0 : i32
    %c0_i32_0 = arith.constant 0 : i32
    %c0_i32_1 = arith.constant 0 : i32
    return %c0_i32, %c0_i32_0 : i32, i32
  }
  func.func @transform_8(%arg0: i32) -> (i32, i32) {
    %c0_i32 = arith.constant 0 : i32
    %c0_i32_0 = arith.constant 0 : i32
    %c0_i32_1 = arith.constant 0 : i32
    return %c0_i32, %c0_i32_0 : i32, i32
  }
  func.func @transform_9(%arg0: i32) -> (i32, i32, i32) {
    %c0_i32 = arith.constant 0 : i32
    %c0_i32_0 = arith.constant 0 : i32
    %c0_i32_1 = arith.constant 0 : i32
    return %arg0, %c0_i32, %c0_i32_0 : i32, i32, i32
  }
}

</mosaic_0001>

<bundles_post_ra>
// kernel: critic_forward.1
= control target key start
LH: loop header
LB: loop body
LE: loop exit
PB: predicated region body
PF: predicated region fallthrough
CT: control target
= control target key end

     0   :  { %vm118_vm0 = vcmask 1043456   ;;  %vm69_vm1 = vcmask 31744   ;;  %vm267_vm2 = vcmask 130048   ;;  %vm515_vm3 = vcmask 523264   ;;  %s1445_s3 = inlined_call_operand.vmem [shape: f32[4,64], index: 3, kind: input, shape index: {}]   ;;  %s1446_s2 = inlined_call_operand.vmem [shape: f32[16,64], index: 2, kind: input, shape index: {}]   ;;  %s1447_s1 = inlined_call_operand.vmem [shape: f32[128,4], index: 1, kind: input, shape index: {}]   ;;  %s1448_s0 = inlined_call_operand.vmem [shape: f32[128,16], index: 0, kind: input, shape index: {}]   ;;  %s1449_s5 = inlined_call_operand.vmem [shape: f32[64,64], index: 5, kind: input, shape index: {}]   ;;  %s1450_s4 = inlined_call_operand.vmem [shape: f32[1,64], index: 4, kind: input, shape index: {}]   ;;  %s1451_s8 = inlined_call_operand.<no memory space> [shape: f32[1,1], index: 8, kind: input, shape index: {}]   ;;  %s1452_s6 = inlined_call_operand.vmem [shape: f32[1,64], index: 6, kind: input, shape index: {}]   ;;  %s1453_s7 = inlined_call_operand.vmem [shape: f32[1,64], index: 7, kind: input, shape index: {}]   ;;  %s1454_s9 = inlined_call_operand.vmem [shape: f32[1,1,128], index: 9, kind: output, shape index: {}]  }
   0x1   :  { %v68_v0 = vld [vmem:[%s1445_s3] sm:$0xf]  ;;  %v51_v1 = vld [vmem:[%s1446_s2 + $0x8] sm:$0xff]  ;;  %v54_v6 = vld [vmem:[%s1447_s1 + $0x10] sm:$0xff]  ;;  %vm1140_vm4 = vmmov 0  }
   0x2   :  { %v52_v2 = vld [vmem:[%s1447_s1] sm:$0xff]  ;;  %1006 = vmatprep.subr.msk.mxu0 %vm118_vm0, %v68_v0  ;;  %1032 = vmatprep.subr.mxu1 %v51_v1  ;;  %v53_v3 = vld [vmem:[%s1447_s1 + $0x8] sm:$0xff]  ;;  %v55_v8 = vld [vmem:[%s1447_s1 + $0x18] sm:$0xff] }
   0x3   :  { %v50_v4 = vld [vmem:[%s1446_s2] sm:$0xff]  ;;  %1007 = vmatpush3.msk.msra.mxu0 %vm118_vm0, %v68_v0  ;;  %1008 = vmatprep.mubr.msk.f32.mxu0 %vm69_vm1, %v52_v2  ;;  %v35_v7 = vld [vmem:[%s1448_s0 + $0x8] sm:$0xff]  ;;  %v36_v9 = vld [vmem:[%s1448_s0 + $0x10] sm:$0xff] }
   0x4   :  { %v34_v5 = vld [vmem:[%s1448_s0] sm:$0xff]  ;;  %1033 = vmatpush3.msra.mxu1 %v51_v1  ;;  %1009 = vmatmul.mubr.msk.f32.vlgmr.msra.gmra.mxu0 %vm69_vm1, %v53_v3  ;;  %v37_v11 = vld [vmem:[%s1448_s0 + $0x18] sm:$0xff]  ;;  %v57_v12 = vld [vmem:[%s1447_s1 + $0x28] sm:$0xff] }
   0x5   :  { %1034 = vmatprep.subr.mxu1 %v50_v4  ;;  %1036 = vmatprep.mubr.msk.f32.mxu1 %vm267_vm2, %v34_v5  ;;  %v56_v10 = vld [vmem:[%s1447_s1 + $0x20] sm:$0xff]  ;;  %v58_v14 = vld [vmem:[%s1447_s1 + $0x30] sm:$0xff]  ;;  %v39_v15 = vld [vmem:[%s1448_s0 + $0x28] sm:$0xff] }
   0x6   :  { %1035 = vmatpush3.msra.mxu1 %v50_v4  ;;  %1011 = vmatprep.mubr.msk.f32.mxu0 %vm69_vm1, %v54_v6  ;;  %v38_v13 = vld [vmem:[%s1448_s0 + $0x20] sm:$0xff]  ;;  %v507_v16 = vld [vmem:[%s1449_s5 + $0x38] sm:$0xff]  ;;  %v40_v18 = vld [vmem:[%s1448_s0 + $0x30] sm:$0xff] }
   0x7   :  { %1037 = vmatmul.mubr.msk.f32.vlgmr.msra.gmra.mxu1 %vm267_vm2, %v35_v7  ;;  %v59_v17 = vld [vmem:[%s1447_s1 + $0x38] sm:$0xff]  ;;  %1060 = vmatprep.subr.mxu0 %v507_v16  ;;  %v506_v19 = vld [vmem:[%s1449_s5 + $0x30] sm:$0xff]  ;;  %v60_v20 = vld [vmem:[%s1447_s1 + $0x40] sm:$0xff] }
   0x8   :  { %1012 = vmatmul.mubr.msk.f32.gmra.mxu0 %vm69_vm1, %v55_v8  ;;  %1039 = vmatprep.mubr.msk.f32.mxu1 %vm267_vm2, %v36_v9  ;;  %v505_v21 = vld [vmem:[%s1449_s5 + $0x28] sm:$0xff]  ;;  %v41_v22 = vld [vmem:[%s1448_s0 + $0x38] sm:$0xff]  ;;  %v42_v24 = vld [vmem:[%s1448_s0 + $0x40] sm:$0xff] }
   0x9   :  { %1014 = vmatprep.mubr.msk.f32.mxu0 %vm69_vm1, %v56_v10  ;;  %1061 = vmatpush3.msra.mxu0 %v507_v16  ;;  %v61_v23 = vld [vmem:[%s1447_s1 + $0x48] sm:$0xff]  ;;  %v62_v25 = vld [vmem:[%s1447_s1 + $0x50] sm:$0xff]  ;;  %v504_v26 = vld [vmem:[%s1449_s5 + $0x20] sm:$0xff] }
   0xa   :  { %1062 = vmatprep.subr.mxu0 %v506_v19  ;;  %v43_v27 = vld [vmem:[%s1448_s0 + $0x48] sm:$0xff]  ;;  %v503_v28 = vld [vmem:[%s1449_s5 + $0x18] sm:$0xff]  ;;  %v44_v30 = vld [vmem:[%s1448_s0 + $0x50] sm:$0xff] }
   0xb   :  { %1040 = vmatmul.mubr.msk.f32.gmra.mxu1 %vm267_vm2, %v37_v11  ;;  %1063 = vmatpush3.msra.mxu0 %v506_v19  ;;  %v63_v29 = vld [vmem:[%s1447_s1 + $0x58] sm:$0xff]  ;;  %v64_v31 = vld [vmem:[%s1447_s1 + $0x60] sm:$0xff]  ;;  %v502_v32 = vld [vmem:[%s1449_s5 + $0x10] sm:$0xff] }
   0xc   :  { %1015 = vmatmul.mubr.msk.f32.gmra.mxu0 %vm69_vm1, %v57_v12  ;;  %1042 = vmatprep.mubr.msk.f32.mxu1 %vm267_vm2, %v38_v13  ;;  %v45_v33 = vld [vmem:[%s1448_s0 + $0x58] sm:$0xff]  ;;  %v65_v34 = vld [vmem:[%s1447_s1 + $0x68] sm:$0xff]  ;;  %v46_v35 = vld [vmem:[%s1448_s0 + $0x60] sm:$0xff] }
   0xd   :  { %1017 = vmatprep.mubr.msk.f32.mxu0 %vm69_vm1, %v58_v14  ;;  %1064 = vmatprep.subr.mxu0 %v505_v21  ;;  %v66_v36 = vld [vmem:[%s1447_s1 + $0x70] sm:$0xff]  ;;  %v47_v37 = vld [vmem:[%s1448_s0 + $0x68] sm:$0xff]  ;;  %v67_v38 = vld [vmem:[%s1447_s1 + $0x78] sm:$0xff] }
   0xe   :  { %1065 = vmatpush3.msra.mxu0 %v505_v21  ;;  %v48_v39 = vld [vmem:[%s1448_s0 + $0x70] sm:$0xff]  ;;  %v49_v40 = vld [vmem:[%s1448_s0 + $0x78] sm:$0xff]  ;;  %v501_v41 = vld [vmem:[%s1449_s5 + $0x8] sm:$0xff] }
   0xf   :  { %1043 = vmatmul.mubr.msk.f32.gmra.mxu1 %vm267_vm2, %v39_v15  ;;  %1066 = vmatprep.subr.mxu0 %v504_v26  ;;  %v500_v42 = vld [vmem:[%s1449_s5] sm:$0xff] }
  0x10   :  { %1018 = vmatmul.mubr.msk.f32.gmra.mxu0 %vm69_vm1, %v59_v17  ;;  %1045 = vmatprep.mubr.msk.f32.mxu1 %vm267_vm2, %v40_v18  ;;  %v1356_v47 = vld [vmem:[%s1450_s4] ss:$0 sm:$0xff] }
  0x11   :  { %1020 = vmatprep.mubr.msk.f32.mxu0 %vm69_vm1, %v60_v20  ;;  %1067 = vmatpush3.msra.mxu0 %v504_v26 }
  0x12   :  { %1068 = vmatprep.subr.mxu0 %v503_v28 }
  0x13   :  { %1046 = vmatmul.mubr.msk.f32.gmra.mxu1 %vm267_vm2, %v41_v22  ;;  %1069 = vmatpush3.msra.mxu0 %v503_v28 }
  0x14   :  { %1021 = vmatmul.mubr.msk.f32.gmra.mxu0 %vm69_vm1, %v61_v23  ;;  %1048 = vmatprep.mubr.msk.f32.mxu1 %vm267_vm2, %v42_v24 }
  0x15   :  { %1023 = vmatprep.mubr.msk.f32.mxu0 %vm69_vm1, %v62_v25  ;;  %1070 = vmatprep.subr.mxu0 %v502_v32 }
  0x16   :  { %1071 = vmatpush3.msra.mxu0 %v502_v32 }
  0x17   :  { %1049 = vmatmul.mubr.msk.f32.gmra.mxu1 %vm267_vm2, %v43_v27  ;;  %1072 = vmatprep.subr.mxu0 %v501_v41 }
  0x18   :  { %1024 = vmatmul.mubr.msk.f32.gmra.mxu0 %vm69_vm1, %v63_v29  ;;  %1051 = vmatprep.mubr.msk.f32.mxu1 %vm267_vm2, %v44_v30 }
  0x19   :  { %1026 = vmatprep.mubr.msk.f32.mxu0 %vm69_vm1, %v64_v31  ;;  %1073 = vmatpush3.msra.mxu0 %v501_v41 }
  0x1a   :  { %1074 = vmatprep.subr.mxu0 %v500_v42 }
  0x1b   :  { %1052 = vmatmul.mubr.msk.f32.gmra.mxu1 %vm267_vm2, %v45_v33  ;;  %1075 = vmatpush3.msra.mxu0 %v500_v42 }
  0x1c   :  { %1027 = vmatmul.mubr.msk.f32.gmra.mxu0 %vm69_vm1, %v65_v34  ;;  %1054 = vmatprep.mubr.msk.f32.mxu1 %vm267_vm2, %v46_v35 }
  0x1d   :  { %1029 = vmatprep.mubr.msk.f32.mxu0 %vm69_vm1, %v66_v36 }
  0x1f   :  { %1055 = vmatmul.mubr.msk.f32.gmra.mxu1 %vm267_vm2, %v47_v37 }
  0x20   :  { %1030 = vmatmul.mubr.msk.f32.gmra.mxu0 %vm69_vm1, %v67_v38  ;;  %1057 = vmatprep.mubr.msk.f32.mxu1 %vm267_vm2, %v48_v39 }
  0x23   :  { %1058 = vmatmul.mubr.msk.f32.gmra.mxu1 %vm267_vm2, %v49_v40 }
  0xc4   :  { %v1010_v43 = vpop.f32.mrf.mxu0 }
  0xc6   :  { %v188_v44 = vpop.f32.mrf.mxu0 }
  0xc7   :  { %v1038_v45 = vpop.f32.mrf.mxu1 }
  0xc8   :  { %v388_v46 = vadd.f32 %v1038_v45, %v1010_v43  ;;  %v1013_v48 = vpop.f32.mrf.mxu0 }
  0xc9   :  { %v382_v49 = vpop.f32.mrf.mxu1 }
  0xca   :  { %v383_v50 = vadd.f32 %v382_v49, %v188_v44  ;;  %v198_v51 = vpop.f32.mrf.mxu0  ;;  %v469_v52 = vadd.f32 %v1356_v47, %v388_v46 }
  0xcb   :  { %v1041_v53 = vpop.f32.mrf.mxu1 }
  0xcc   :  { %v468_v54 = vadd.f32 %v1356_v47, %v383_v50  ;;  %v398_v55 = vadd.f32 %v1041_v53, %v1013_v48  ;;  %v1016_v56 = vpop.f32.mrf.mxu0  ;;  %v485_v61 = vmax.f32 %v469_v52, 0.0 }
  0xcd   :  { %v392_v57 = vpop.f32.mrf.mxu1 }
  0xce   :  { %v484_v58 = vmax.f32 %v468_v54, 0.0  ;;  %v393_v59 = vadd.f32 %v392_v57, %v198_v51  ;;  %v208_v60 = vpop.f32.mrf.mxu0  ;;  %v471_v62 = vadd.f32 %v1356_v47, %v398_v55 }
  0xcf   :  { %v1044_v63 = vpop.f32.mrf.mxu1 }
  0xd0   :  { %v470_v0 = vadd.f32 %v1356_v47, %v393_v59  ;;  %v408_v1 = vadd.f32 %v1044_v63, %v1016_v56  ;;  %1076 = vmatprep.mubr.msk.f32.mxu0 %vm515_vm3, %v484_v58  ;;  %v1019_v2 = vpop.f32.mrf.mxu0  ;;  %v487_v7 = vmax.f32 %v471_v62, 0.0  ;;  %v1141_v62 = vmov 0  }
  0xd1   :  { %v402_v3 = vpop.f32.mrf.mxu1  ;;  %1077 = vmatmul.mubr.msk.f32.vlgmr.msra.gmra.mxu0 %vm515_vm3, %v485_v61  ;;  %v1139_v61 = vmov 0.0   ;;  %1138 = vset.pattern.permute.xlu0 %v1141_v62 }
  0xd2   :  { %v486_v4 = vmax.f32 %v470_v0, 0.0  ;;  %v403_v5 = vadd.f32 %v402_v3, %v208_v60  ;;  %v218_v6 = vpop.f32.mrf.mxu0  ;;  %v473_v8 = vadd.f32 %v1356_v47, %v408_v1  ;;  %1100 = vmatprep.subr.mxu1 %v1139_v61  ;;  %1132 = vmatprep.mubr.msk.f32.mxu1 %vm1140_vm4, %v1139_v61 }
  0xd3   :  { %v1047_v9 = vpop.f32.mrf.mxu1 }
  0xd4   :  { %v472_v10 = vadd.f32 %v1356_v47, %v403_v5  ;;  %v418_v11 = vadd.f32 %v1047_v9, %v1019_v2  ;;  %1079 = vmatprep.mubr.msk.f32.mxu0 %vm515_vm3, %v486_v4  ;;  %v1022_v12 = vpop.f32.mrf.mxu0  ;;  %v489_v17 = vmax.f32 %v473_v8, 0.0 }
  0xd5   :  { %v412_v13 = vpop.f32.mrf.mxu1  ;;  %1080 = vmatmul.mubr.msk.f32.gmra.mxu0 %vm515_vm3, %v487_v7 }
  0xd6   :  { %v488_v14 = vmax.f32 %v472_v10, 0.0  ;;  %v413_v15 = vadd.f32 %v412_v13, %v218_v6  ;;  %v228_v16 = vpop.f32.mrf.mxu0  ;;  %v475_v18 = vadd.f32 %v1356_v47, %v418_v11 }
  0xd7   :  { %v1050_v19 = vpop.f32.mrf.mxu1 }
  0xd8   :  { %v474_v20 = vadd.f32 %v1356_v47, %v413_v15  ;;  %v428_v21 = vadd.f32 %v1050_v19, %v1022_v12  ;;  %1082 = vmatprep.mubr.msk.f32.mxu0 %vm515_vm3, %v488_v14  ;;  %v1025_v22 = vpop.f32.mrf.mxu0  ;;  %v491_v27 = vmax.f32 %v475_v18, 0.0  ;;  %v896_v14 = vld [vmem:[%s1452_s6] ss:$0 sm:$0xff] }
  0xd9   :  { %v422_v23 = vpop.f32.mrf.mxu1  ;;  %1083 = vmatmul.mubr.msk.f32.gmra.mxu0 %vm515_vm3, %v489_v17 }
  0xda   :  { %v490_v24 = vmax.f32 %v474_v20, 0.0  ;;  %v423_v25 = vadd.f32 %v422_v23, %v228_v16  ;;  %v238_v26 = vpop.f32.mrf.mxu0  ;;  %v477_v28 = vadd.f32 %v1356_v47, %v428_v21 }
  0xdb   :  { %v1053_v29 = vpop.f32.mrf.mxu1 }
  0xdc   :  { %v476_v30 = vadd.f32 %v1356_v47, %v423_v25  ;;  %v438_v31 = vadd.f32 %v1053_v29, %v1025_v22  ;;  %1085 = vmatprep.mubr.msk.f32.mxu0 %vm515_vm3, %v490_v24  ;;  %v1028_v32 = vpop.f32.mrf.mxu0  ;;  %v493_v37 = vmax.f32 %v477_v28, 0.0 }
  0xdd   :  { %v432_v33 = vpop.f32.mrf.mxu1  ;;  %1086 = vmatmul.mubr.msk.f32.gmra.mxu0 %vm515_vm3, %v491_v27 }
  0xde   :  { %v492_v34 = vmax.f32 %v476_v30, 0.0  ;;  %v433_v35 = vadd.f32 %v432_v33, %v238_v26  ;;  %v248_v36 = vpop.f32.mrf.mxu0  ;;  %v479_v38 = vadd.f32 %v1356_v47, %v438_v31 }
  0xdf   :  { %v1056_v39 = vpop.f32.mrf.mxu1 }
  0xe0   :  { %v478_v40 = vadd.f32 %v1356_v47, %v433_v35  ;;  %v448_v41 = vadd.f32 %v1056_v39, %v1028_v32  ;;  %1088 = vmatprep.mubr.msk.f32.mxu0 %vm515_vm3, %v492_v34  ;;  %v1031_v42 = vpop.f32.mrf.mxu0  ;;  %v495_v46 = vmax.f32 %v479_v38, 0.0 }
  0xe1   :  { %v442_v43 = vpop.f32.mrf.mxu1  ;;  %1089 = vmatmul.mubr.msk.f32.gmra.mxu0 %vm515_vm3, %v493_v37 }
  0xe2   :  { %v494_v44 = vmax.f32 %v478_v40, 0.0  ;;  %v443_v45 = vadd.f32 %v442_v43, %v248_v36  ;;  %v481_v48 = vadd.f32 %v1356_v47, %v448_v41  ;;  %v258_v52 = vpop.f32.mrf.mxu0 }
  0xe3   :  { %v1059_v49 = vpop.f32.mrf.mxu1 }
  0xe4   :  { %v480_v50 = vadd.f32 %v1356_v47, %v443_v45  ;;  %v458_v51 = vadd.f32 %v1059_v49, %v1031_v42  ;;  %1091 = vmatprep.mubr.msk.f32.mxu0 %vm515_vm3, %v494_v44  ;;  %v497_v56 = vmax.f32 %v481_v48, 0.0 }
  0xe5   :  { %v452_v53 = vpop.f32.mrf.mxu1  ;;  %1092 = vmatmul.mubr.msk.f32.gmra.mxu0 %vm515_vm3, %v495_v46 }
  0xe6   :  { %v496_v54 = vmax.f32 %v480_v50, 0.0  ;;  %v453_v55 = vadd.f32 %v452_v53, %v258_v52  ;;  %v483_v57 = vadd.f32 %v1356_v47, %v458_v51  ;;  %v725_v50 = vld [vmem:[%s1453_s7] sm:$0x1]  ;;  %v732_v51 = vlaneseq }
  0xe8   :  { %v482_v58 = vadd.f32 %v1356_v47, %v453_v55  ;;  %1094 = vmatprep.mubr.msk.f32.mxu0 %vm515_vm3, %v496_v54  ;;  %v499_v60 = vmax.f32 %v483_v57, 0.0  ;;  %v14_v47 = vstv %s1451_s8  ;;  %v733_v52 = vshrl.u32 %v732_v51, 7 }
  0xe9   :  { %1095 = vmatmul.mubr.msk.f32.gmra.mxu0 %vm515_vm3, %v497_v56  ;;  %15 = vst [vmem:[#allocation2] sm:$0x1] %v14_v47 }
  0xea   :  { %v498_v59 = vmax.f32 %v482_v58, 0.0  ;;  %v734_v53 = vsub.s32 0, %v733_v52 }
  0xec   :  { %1097 = vmatprep.mubr.msk.f32.mxu0 %vm515_vm3, %v498_v59 }
  0xed   :  { %1098 = vmatmul.mubr.msk.f32.gmra.mxu0 %vm515_vm3, %v499_v60 }
  0xf0   :  { %v726_v63 = vld [vmem:[#allocation2] sm:$0x1] }
  0xf1   :  { %729 = vperm.xlu0 %1138, %v726_v63  }
 0x16c   :  { %v730_v54 = vpop.permute.xlu0 %729 }
 0x16d   :  { %v735_v55 = vrot.slane %v730_v54, %v734_v53 }
 0x191   :  { %v1395_v0 = vpop.f32.mrf.mxu0 }
 0x192   :  { %v636_v44 = vadd.f32 %v1395_v0, %v896_v14 }
 0x193   :  { %v1397_v1 = vpop.f32.mrf.mxu0 }
 0x194   :  { %v710_v46 = vmax.f32 %v636_v44, 0.0  ;;  %v631_v48 = vadd.f32 %v896_v14, %v1397_v1 }
 0x195   :  { %v1081_v2 = vpop.f32.mrf.mxu0 }
 0x196   :  { %v646_v40 = vadd.f32 %v1081_v2, %v896_v14  ;;  %v709_v49 = vmax.f32 %v631_v48, 0.0 }
 0x197   :  { %v1399_v3 = vpop.f32.mrf.mxu0 }
 0x198   :  { %v712_v42 = vmax.f32 %v646_v40, 0.0  ;;  %v641_v43 = vadd.f32 %v896_v14, %v1399_v3 }
 0x199   :  { %v1084_v4 = vpop.f32.mrf.mxu0 }
 0x19a   :  { %v656_v36 = vadd.f32 %v1084_v4, %v896_v14  ;;  %v711_v45 = vmax.f32 %v641_v43, 0.0 }
 0x19b   :  { %v650_v5 = vpop.f32.mrf.mxu0 }
 0x19c   :  { %v714_v38 = vmax.f32 %v656_v36, 0.0  ;;  %v651_v39 = vadd.f32 %v896_v14, %v650_v5 }
 0x19d   :  { %v1087_v6 = vpop.f32.mrf.mxu0 }
 0x19e   :  { %v666_v32 = vadd.f32 %v1087_v6, %v896_v14  ;;  %v713_v41 = vmax.f32 %v651_v39, 0.0 }
 0x19f   :  { %v660_v7 = vpop.f32.mrf.mxu0 }
 0x1a0   :  { %v716_v34 = vmax.f32 %v666_v32, 0.0  ;;  %v661_v35 = vadd.f32 %v896_v14, %v660_v7 }
 0x1a1   :  { %v1090_v8 = vpop.f32.mrf.mxu0 }
 0x1a2   :  { %v676_v28 = vadd.f32 %v1090_v8, %v896_v14  ;;  %v715_v37 = vmax.f32 %v661_v35, 0.0 }
 0x1a3   :  { %v670_v9 = vpop.f32.mrf.mxu0 }
 0x1a4   :  { %v718_v30 = vmax.f32 %v676_v28, 0.0  ;;  %v671_v31 = vadd.f32 %v896_v14, %v670_v9 }
 0x1a5   :  { %v1093_v10 = vpop.f32.mrf.mxu0 }
 0x1a6   :  { %v686_v24 = vadd.f32 %v1093_v10, %v896_v14  ;;  %v717_v33 = vmax.f32 %v671_v31, 0.0 }
 0x1a7   :  { %v680_v11 = vpop.f32.mrf.mxu0 }
 0x1a8   :  { %v720_v26 = vmax.f32 %v686_v24, 0.0  ;;  %v681_v27 = vadd.f32 %v896_v14, %v680_v11 }
 0x1a9   :  { %v1096_v12 = vpop.f32.mrf.mxu0 }
 0x1aa   :  { %v696_v20 = vadd.f32 %v1096_v12, %v896_v14  ;;  %v719_v29 = vmax.f32 %v681_v27, 0.0 }
 0x1ab   :  { %v690_v13 = vpop.f32.mrf.mxu0 }
 0x1ac   :  { %v722_v22 = vmax.f32 %v696_v20, 0.0  ;;  %v691_v23 = vadd.f32 %v896_v14, %v690_v13 }
 0x1ad   :  { %v1099_v15 = vpop.f32.mrf.mxu0 }
 0x1ae   :  { %v706_v16 = vadd.f32 %v1099_v15, %v896_v14  ;;  %v721_v25 = vmax.f32 %v691_v23, 0.0 }
 0x1af   :  { %v700_v17 = vpop.f32.mrf.mxu0 }
 0x1b0   :  { %v724_v18 = vmax.f32 %v706_v16, 0.0  ;;  %v701_v19 = vadd.f32 %v896_v14, %v700_v17 }
 0x1b2   :  { %1101 = vmatpush3.xpose.msk.msra.mxu1 %vm515_vm3, %v724_v18  ;;  %v723_v21 = vmax.f32 %v701_v19, 0.0 }
 0x1b3   :  { %1102 = vmatprep.subr.mxu1 %v1139_v61 }
 0x1b6   :  { %1103 = vmatpush3.xpose.msk.msra.mxu1 %vm515_vm3, %v723_v21 }
 0x1b7   :  { %1104 = vmatprep.subr.mxu1 %v1139_v61 }
 0x1ba   :  { %1105 = vmatpush3.xpose.msk.msra.mxu1 %vm515_vm3, %v722_v22 }
 0x1bb   :  { %1106 = vmatprep.subr.mxu1 %v1139_v61 }
 0x1be   :  { %1107 = vmatpush3.xpose.msk.msra.mxu1 %vm515_vm3, %v721_v25 }
 0x1bf   :  { %1108 = vmatprep.subr.mxu1 %v1139_v61 }
 0x1c2   :  { %1109 = vmatpush3.xpose.msk.msra.mxu1 %vm515_vm3, %v720_v26 }
 0x1c3   :  { %1110 = vmatprep.subr.mxu1 %v1139_v61 }
 0x1c6   :  { %1111 = vmatpush3.xpose.msk.msra.mxu1 %vm515_vm3, %v719_v29 }
 0x1c7   :  { %1112 = vmatprep.subr.mxu1 %v1139_v61 }
 0x1ca   :  { %1113 = vmatpush3.xpose.msk.msra.mxu1 %vm515_vm3, %v718_v30 }
 0x1cb   :  { %1114 = vmatprep.subr.mxu1 %v1139_v61 }
 0x1ce   :  { %1115 = vmatpush3.xpose.msk.msra.mxu1 %vm515_vm3, %v717_v33 }
 0x1cf   :  { %1116 = vmatprep.subr.mxu1 %v1139_v61 }
 0x1d2   :  { %1117 = vmatpush3.xpose.msk.msra.mxu1 %vm515_vm3, %v716_v34 }
 0x1d3   :  { %1118 = vmatprep.subr.mxu1 %v1139_v61 }
 0x1d6   :  { %1119 = vmatpush3.xpose.msk.msra.mxu1 %vm515_vm3, %v715_v37 }
 0x1d7   :  { %1120 = vmatprep.subr.mxu1 %v1139_v61 }
 0x1da   :  { %1121 = vmatpush3.xpose.msk.msra.mxu1 %vm515_vm3, %v714_v38 }
 0x1db   :  { %1122 = vmatprep.subr.mxu1 %v1139_v61 }
 0x1de   :  { %1123 = vmatpush3.xpose.msk.msra.mxu1 %vm515_vm3, %v713_v41 }
 0x1df   :  { %1124 = vmatprep.subr.mxu1 %v1139_v61 }
 0x1e2   :  { %1125 = vmatpush3.xpose.msk.msra.mxu1 %vm515_vm3, %v712_v42 }
 0x1e3   :  { %1126 = vmatprep.subr.mxu1 %v1139_v61 }
 0x1e6   :  { %1127 = vmatpush3.xpose.msk.msra.mxu1 %vm515_vm3, %v711_v45 }
 0x1e7   :  { %1128 = vmatprep.subr.mxu1 %v1139_v61 }
 0x1ea   :  { %1129 = vmatpush3.xpose.msk.msra.mxu1 %vm515_vm3, %v710_v46 }
 0x1eb   :  { %1130 = vmatprep.subr.mxu1 %v1139_v61 }
 0x1ee   :  { %1131 = vmatpush3.xpose.msk.msra.mxu1 %vm515_vm3, %v709_v49 }
 0x1f1   :  { %1133 = vmatmul.mubr.msk.f32.vlgmr.msra.gmra.mxu1 %vm515_vm3, %v725_v50 }
 0x2b1   :  { %v853_v56 = vpop.f32.mrf.mxu1 }
 0x2b2   :  { %v854_v57 = vadd.f32 %v853_v56, %v735_v55 }
 0x2b3   :  { %v1134_v58 = vpop.f32.mrf.mxu1 }
 0x2b4   :  { %857 = vst [vmem:[%s1454_s9] sm:$0x1] %v854_v57 }

</bundles_post_ra>
